<compile_context>
chip_gen: v6e
topology: v6e:2x2x1
jax: 0.10.0
libtpu: 0.0.40
codegen_flags: <defaults>
</compile_context>

<pallas_src>
import functools
import math

import jax
import jax.numpy as jnp
from jax.experimental import pallas as pl
from jax.experimental.pallas import tpu as pltpu

LANES = 128
SUBLANES = 8
MAX_BLOCK_ROWS = 2048   # (2048, 128) f32 = 1 MiB per input per grid step


def _robust_focal_kernel(x_ref, t_ref, out_ref, *, alpha, gamma,
                         class_weights, block_rows, blocks_per_core,
                         rows_valid):
    c = pl.program_id(0)   # shard axis ('parallel')
    j = pl.program_id(1)   # reduction axis ('arbitrary')

    @pl.when(j == 0)
    def _():
        out_ref[...] = jnp.zeros_like(out_ref)

    x = x_ref[...].astype(jnp.float32)
    t = t_ref[...].astype(jnp.float32)

    # Shared softplus: bce(x, t') = max(x, 0) - x*t' + log1p(exp(-|x|))
    base = jnp.maximum(x, 0.0) + jnp.log1p(jnp.exp(-jnp.abs(x)))

    bce = base - x * t
    if class_weights is not None:
        cw0 = float(class_weights[0])
        cw1 = float(class_weights[1])
        bce = bce * jnp.where(t > 0.0, cw1, cw0)

    pt = jnp.exp(-bce)
    one_minus_pt = 1.0 - pt
    if gamma == 1.0:
        mod = one_minus_pt
    elif gamma == 2.0:
        mod = one_minus_pt * one_minus_pt
    else:
        mod = one_minus_pt ** gamma
    focal = alpha * mod * bce

    label_smooth = base - x * (t * 0.9 + 0.05)       # bce(x, 0.9*t + 0.05)
    combined = 0.8 * focal + 0.2 * label_smooth

    # Mask rows past the end of the (lane-padded) input: covers the ragged
    # final block and any duplicate block read by the clamped shard index_map.
    block_start = (c * blocks_per_core + j) * block_rows
    row = jax.lax.broadcasted_iota(jnp.int32, (block_rows, LANES), 0)
    combined = jnp.where(row < (rows_valid - block_start), combined, 0.0)

    # Per-lane/sublane partial sums: pure VPU adds into the resident (8,128)
    # output accumulator; the cross-lane reduce happens once in the wrapper.
    out_ref[...] += combined.reshape(-1, SUBLANES, LANES).sum(axis=0)


def robust_focal_loss(inputs, targets, *, alpha=0.25, gamma=1.0,
                      class_weights=None, reduction='mean', num_shards=2):
    """JAX/Pallas equivalent of RobustFocalLoss.forward ('mean'/'sum')."""
    # TODO(synk): reduction='none' (elementwise output) not wired up in-kernel.
    assert reduction in ('mean', 'sum')
    assert inputs.shape == targets.shape

    n = int(inputs.size)
    x = inputs.reshape(-1)
    t = targets.reshape(-1)

    # Only pad (with zeros) when the element count is not a multiple of one
    # (8, 128) sub-tile; the common aligned case is a copy-free reshape.
    sub = SUBLANES * LANES
    pad = (-n) % sub
    if pad:
        x = jnp.pad(x, (0, pad))
        t = jnp.pad(t, (0, pad))
    rows = (n + pad) // LANES                       # multiple of 8

    block_rows = min(MAX_BLOCK_ROWS, rows)
    total_blocks = pl.cdiv(rows, block_rows)
    num_shards = max(1, min(int(num_shards), total_blocks))
    blocks_per_core = pl.cdiv(total_blocks, num_shards)

    x2 = x.reshape(rows, LANES)
    t2 = t.reshape(rows, LANES)

    kernel = functools.partial(
        _robust_focal_kernel,
        alpha=float(alpha), gamma=float(gamma), class_weights=class_weights,
        block_rows=block_rows, blocks_per_core=blocks_per_core,
        rows_valid=rows)

    def in_map(c, j):
        # Clamp so every DMA stays in bounds; any duplicated block is fully
        # masked to zero inside the kernel.
        return (jnp.minimum(c * blocks_per_core + j, total_blocks - 1), 0)

    partials = pl.pallas_call(
        kernel,
        out_shape=jax.ShapeDtypeStruct((num_shards * SUBLANES, LANES),
                                       jnp.float32),
        grid_spec=pltpu.PrefetchScalarGridSpec(
            num_scalar_prefetch=0,
            grid=(num_shards, blocks_per_core),
            in_specs=[
                pl.BlockSpec((block_rows, LANES), in_map),
                pl.BlockSpec((block_rows, LANES), in_map),
            ],
            out_specs=pl.BlockSpec((SUBLANES, LANES), lambda c, j: (c, 0)),
        ),
        compiler_params=pltpu.CompilerParams(
            dimension_semantics=("parallel", "arbitrary")),
    )(x2, t2)

    total = jnp.sum(partials)

    if pad:
        # Zero-padded tail elements (x=0, t=0) contribute a known constant
        # each; subtract it instead of lane-masking in the hot loop.
        bce0 = math.log(2.0)
        if class_weights is not None:
            bce0 *= float(class_weights[0])
        pt0 = math.exp(-bce0)
        focal0 = float(alpha) * (1.0 - pt0) ** float(gamma) * bce0
        combined0 = 0.8 * focal0 + 0.2 * math.log(2.0)
        total = total - jnp.float32(pad * combined0)

    if reduction == 'mean':
        return total / jnp.float32(n)
    return total


def robust_focal_loss_ref(inputs, targets, *, alpha=0.25, gamma=1.0,
                          class_weights=None, reduction='mean'):
    """Pure-JAX reference mirroring the PyTorch module."""
    x = inputs.astype(jnp.float32)
    t = targets.astype(jnp.float32)
    bce = jnp.maximum(x, 0.0) - x * t + jnp.log1p(jnp.exp(-jnp.abs(x)))
    if class_weights is not None:
        w = jnp.where(t > 0.0, class_weights[1], class_weights[0])
        bce = bce * w
    pt = jnp.exp(-bce)
    focal = alpha * (1.0 - pt) ** gamma * bce
    sm = t * 0.9 + 0.05
    ls = jnp.maximum(x, 0.0) - x * sm + jnp.log1p(jnp.exp(-jnp.abs(x)))
    combined = 0.8 * focal + 0.2 * ls
    if reduction == 'mean':
        return combined.mean()
    return combined.sum()


if __name__ == "__main__":
    key = jax.random.PRNGKey(0)
    k1, k2, k3, k4 = jax.random.split(key, 4)

    # small segmentation-style shape: [B, C, H, W]
    B, C, H, W = 2, 4, 16, 16
    inputs = jax.random.normal(k1, (B, C, H, W), dtype=jnp.float32) * 2.0
    targets = (jax.random.uniform(k2, (B, C, H, W)) > 0.7).astype(jnp.float32)

    # default config (class_weights=None, reduction='mean')
    out = robust_focal_loss(inputs, targets)
    ref = robust_focal_loss_ref(inputs, targets)
    jax.block_until_ready(out)
    assert jnp.allclose(out, ref, rtol=1e-5, atol=1e-6), (out, ref)

    # class weights + sum reduction (exercises the weight-mask path)
    cw = (1.0, 3.0)
    out2 = robust_focal_loss(inputs, targets, class_weights=cw, reduction='sum')
    ref2 = robust_focal_loss_ref(inputs, targets, class_weights=cw,
                                 reduction='sum')
    jax.block_until_ready(out2)
    assert jnp.allclose(out2, ref2, rtol=1e-5, atol=1e-4), (out2, ref2)

    # ragged element count + gamma=2 (exercises zero-pad correction path)
    inputs3 = jax.random.normal(k3, (3, 5, 7, 11), dtype=jnp.float32)
    targets3 = (jax.random.uniform(k4, (3, 5, 7, 11)) > 0.5).astype(jnp.float32)
    out3 = robust_focal_loss(inputs3, targets3, gamma=2.0)
    ref3 = robust_focal_loss_ref(inputs3, targets3, gamma=2.0)
    jax.block_until_ready(out3)
    assert jnp.allclose(out3, ref3, rtol=1e-5, atol=1e-5), (out3, ref3)

    print("KERNEL_OK")
</pallas_src>

<mosaic_0001>
module attributes {stable_mosaic.version = 11 : i64} {
  func.func @_robust_focal_kernel(%arg0: i32, %arg1: i32, %arg2: memref<16x128xf32, #tpu.memory_space<vmem>>, %arg3: memref<16x128xf32, #tpu.memory_space<vmem>>, %arg4: memref<8x128xf32, #tpu.memory_space<vmem>>) attributes {dimension_semantics = [#tpu.dimension_semantics<parallel>, #tpu.dimension_semantics<arbitrary>], iteration_bounds = array<i64: 1, 1>, scalar_prefetch = 0 : i64, scratch_operands = 0 : i64, tpu.core_type = #tpu.core_type<tc>, window_params = [{transform_indices = @transform_0, window_bounds = array<i64: 16, 128>}, {transform_indices = @transform_1, window_bounds = array<i64: 16, 128>}, {transform_indices = @transform_2, window_bounds = array<i64: 8, 128>}]} {
    %c0_i32 = arith.constant 0 : i32
    %0 = arith.cmpi eq, %arg1, %c0_i32 : i32
    %1 = arith.extui %0 : i1 to i32
    %c0_i32_0 = arith.constant 0 : i32
    %2 = arith.cmpi ne, %1, %c0_i32_0 : i32
    scf.if %2 {
      %cst_19 = arith.constant 0.000000e+00 : f32
      %48 = vector.broadcast %cst_19 : f32 to vector<8x128xf32>
      %c0_20 = arith.constant 0 : index
      %c0_21 = arith.constant 0 : index
      %49 = vector.load %arg4[%c0_20, %c0_21] : memref<8x128xf32, #tpu.memory_space<vmem>>, vector<8x128xf32>
      tpu.vector_store %arg4[%c0_20, %c0_21], %48 {strides = array<i32>} : memref<8x128xf32, #tpu.memory_space<vmem>>, vector<8x128xf32>,
    } else {
    }
    %c0 = arith.constant 0 : index
    %c0_1 = arith.constant 0 : index
    %3 = vector.load %arg2[%c0, %c0_1] : memref<16x128xf32, #tpu.memory_space<vmem>>, vector<16x128xf32>
    %c0_2 = arith.constant 0 : index
    %c0_3 = arith.constant 0 : index
    %4 = vector.load %arg3[%c0_2, %c0_3] : memref<16x128xf32, #tpu.memory_space<vmem>>, vector<16x128xf32>
    %cst = arith.constant 0.000000e+00 : f32
    %5 = vector.broadcast %cst : f32 to vector<16x128xf32>
    %6 = arith.maximumf %3, %5 : vector<16x128xf32>
    %7 = math.absf %3 : vector<16x128xf32>
    %cst_4 = arith.constant 0.000000e+00 : f32
    %8 = vector.broadcast %cst_4 : f32 to vector<16x128xf32>
    %9 = arith.subf %8, %7 : vector<16x128xf32>
    %10 = math.exp %9 : vector<16x128xf32>
    %11 = math.log1p %10 : vector<16x128xf32>
    %12 = arith.addf %6, %11 : vector<16x128xf32>
    %13 = arith.mulf %3, %4 : vector<16x128xf32>
    %14 = arith.subf %12, %13 : vector<16x128xf32>
    %cst_5 = arith.constant 0.000000e+00 : f32
    %15 = vector.broadcast %cst_5 : f32 to vector<16x128xf32>
    %16 = arith.subf %15, %14 : vector<16x128xf32>
    %17 = math.exp %16 : vector<16x128xf32>
    %cst_6 = arith.constant 1.000000e+00 : f32
    %18 = vector.broadcast %cst_6 : f32 to vector<16x128xf32>
    %19 = arith.subf %18, %17 : vector<16x128xf32>
    %cst_7 = arith.constant 2.500000e-01 : f32
    %20 = vector.broadcast %cst_7 : f32 to vector<16x128xf32>
    %21 = arith.mulf %20, %19 : vector<16x128xf32>
    %22 = arith.mulf %21, %14 : vector<16x128xf32>
    %cst_8 = arith.constant 0.899999976 : f32
    %23 = vector.broadcast %cst_8 : f32 to vector<16x128xf32>
    %24 = arith.mulf %4, %23 : vector<16x128xf32>
    %cst_9 = arith.constant 5.000000e-02 : f32
    %25 = vector.broadcast %cst_9 : f32 to vector<16x128xf32>
    %26 = arith.addf %24, %25 : vector<16x128xf32>
    %27 = arith.mulf %3, %26 : vector<16x128xf32>
    %28 = arith.subf %12, %27 : vector<16x128xf32>
    %cst_10 = arith.constant 8.000000e-01 : f32
    %29 = vector.broadcast %cst_10 : f32 to vector<16x128xf32>
    %30 = arith.mulf %29, %22 : vector<16x128xf32>
    %cst_11 = arith.constant 2.000000e-01 : f32
    %31 = vector.broadcast %cst_11 : f32 to vector<16x128xf32>
    %32 = arith.mulf %31, %28 : vector<16x128xf32>
    %33 = arith.addf %30, %32 : vector<16x128xf32>
    %c1_i32 = arith.constant 1 : i32
    %34 = arith.muli %arg0, %c1_i32 : i32
    %35 = arith.addi %34, %arg1 : i32
    %c16_i32 = arith.constant 16 : i32
    %36 = arith.muli %35, %c16_i32 : i32
    %37 = tpu.iota {dimensions = array<i32: 0>} : vector<16x128xi32>
    %c16_i32_12 = arith.constant 16 : i32
    %38 = arith.subi %c16_i32_12, %36 : i32
    %39 = vector.broadcast %38 : i32 to vector<16x128xi32>
    %40 = arith.cmpi slt, %37, %39 : vector<16x128xi32>
    %cst_13 = arith.constant 0.000000e+00 : f32
    %41 = vector.broadcast %cst_13 : f32 to vector<16x128xf32>
    %42 = arith.select %40, %33, %41 : vector<16x128xi1>, vector<16x128xf32>
    %c0_14 = arith.constant 0 : index
    %c0_15 = arith.constant 0 : index
    %43 = vector.load %arg4[%c0_14, %c0_15] : memref<8x128xf32, #tpu.memory_space<vmem>>, vector<8x128xf32>
    %44 = vector.shape_cast %42 : vector<16x128xf32> to vector<2x8x128xf32>
    %cst_16 = arith.constant dense<0.000000e+00> : vector<8x128xf32>
    %45 = vector.multi_reduction <add>, %44, %cst_16 [0] : vector<2x8x128xf32> to vector<8x128xf32>
    %46 = arith.addf %43, %45 : vector<8x128xf32>
    %c0_17 = arith.constant 0 : index
    %c0_18 = arith.constant 0 : index
    %47 = vector.load %arg4[%c0_17, %c0_18] : memref<8x128xf32, #tpu.memory_space<vmem>>, vector<8x128xf32>
    tpu.vector_store %arg4[%c0_17, %c0_18], %46 {strides = array<i32>} : memref<8x128xf32, #tpu.memory_space<vmem>>, vector<8x128xf32>,
    return
  }
  func.func @transform_0(%arg0: i32, %arg1: i32) -> (i32, i32) {
    %c1_i32 = arith.constant 1 : i32
    %0 = arith.muli %arg0, %c1_i32 : i32
    %1 = arith.addi %0, %arg1 : i32
    %c0_i32 = arith.constant 0 : i32
    %2 = arith.minsi %1, %c0_i32 : i32
    %c0_i32_0 = arith.constant 0 : i32
    %c0_i32_1 = arith.constant 0 : i32
    return %2, %c0_i32_0 : i32, i32
  }
  func.func @transform_1(%arg0: i32, %arg1: i32) -> (i32, i32) {
    %c1_i32 = arith.constant 1 : i32
    %0 = arith.muli %arg0, %c1_i32 : i32
    %1 = arith.addi %0, %arg1 : i32
    %c0_i32 = arith.constant 0 : i32
    %2 = arith.minsi %1, %c0_i32 : i32
    %c0_i32_0 = arith.constant 0 : i32
    %c0_i32_1 = arith.constant 0 : i32
    return %2, %c0_i32_0 : i32, i32
  }
  func.func @transform_2(%arg0: i32, %arg1: i32) -> (i32, i32) {
    %c0_i32 = arith.constant 0 : i32
    %c0_i32_0 = arith.constant 0 : i32
    return %arg0, %c0_i32 : i32, i32
  }
}

</mosaic_0001>

<bundles_post_ra>
// kernel: tpu_custom_call.1
= control target key start
LH: loop header
LB: loop body
LE: loop exit
PB: predicated region body
PF: predicated region fallthrough
CT: control target
= control target key end

     0   :  { %7 = vsyncpa [#allocation3], 0  ;;  %s277_s0 = inlined_call_operand.hbm [shape: f32[16,128], index: 0, kind: input, shape index: {}]   ;;  %s278_s1 = inlined_call_operand.hbm [shape: f32[16,128], index: 1, kind: input, shape index: {}]   ;;  %s279_s2 = inlined_call_operand.hbm [shape: f32[8,128], index: 2, kind: output, shape index: {}]  }
   0x1   :  { %8 = vsyncpa [#allocation6], 0 }
   0x2   :  { %9 = vsyncpa [#allocation4], 0  ;;  %s248_s9 = smov [#allocation2]  }
   0x3   :  { %s21_s10 = sshll.u32 %s248_s9, 4  ;;  %s22_s10 = int_to_ptr.vmem [resolvable:$true] %s21_s10 }
   0x4   :  { %s190_s11 = scalar_lea.vmem %s22_s10, 256  ;;  %p195_p1 = scmp.lt.s32.totalorder %s22_s10, %s22_s10 }
   0x5   :  { %p191_p0 = scmp.ne.s32.totalorder %s22_s10, %s190_s11  ;;  %p196_p2 = scmp.lt.s32.totalorder %s190_s11, %s190_s11 }
   0x7   :  { %p197_p3 = por %p196_p2, %p195_p1 }
   0x9   :  { %p198_p4 = pnand %p197_p3, %p191_p0 }
   0xb   :  { %201 = shalt.err (!%p198_p4)
}
   0xc   :  { %s249_s12 = smov 128   ;;  %s250_s13 = smov 8  }
   0xd   :  { %27 = dma.hbm_to_vmem [thread:$0]  %s277_s0, 256, %s22_s10, [#allocation3], %s249_s12, %s249_s12, %s250_s13  }
   0xe   :  { %s251_s16 = smov [#allocation5]  }
   0xf   :  { %s39_s17 = sshll.u32 %s251_s16, 4  ;;  %s40_s17 = int_to_ptr.vmem [resolvable:$true] %s39_s17 }
  0x10   :  { %s210_s18 = scalar_lea.vmem %s40_s17, 256  ;;  %p215_p6 = scmp.lt.s32.totalorder %s40_s17, %s40_s17 }
  0x11   :  { %p211_p5 = scmp.ne.s32.totalorder %s40_s17, %s210_s18  ;;  %p216_p7 = scmp.lt.s32.totalorder %s210_s18, %s210_s18 }
  0x13   :  { %p217_p8 = por %p216_p7, %p215_p6 }
  0x15   :  { %p218_p9 = pnand %p217_p8, %p211_p5 }
  0x17   :  { %221 = shalt.err (!%p218_p9)
}
  0x18   :  { %45 = dma.hbm_to_vmem [thread:$0]  %s278_s1, 256, %s40_s17, [#allocation6], %s249_s12, %s249_s12, %s250_s13  }
  0x19   :  { %242 = dma.done.wait [#allocation3], 256  }
  0x1a   :  { %243 = vsyncadd [#allocation3], 4294967040 }
  0x1b   :  { %244 = dma.done.wait [#allocation6], 256  }
  0x1c   :  { %245 = vsyncadd [#allocation6], 4294967040  ;;  %v65_v0 = vld [vmem:[#allocation2] sm:$0xff]  ;;  %v66_v1 = vld [vmem:[#allocation2 + $0x8] sm:$0xff]  ;;  %s252_s0 = smov [#allocation7]  }
  0x1d   :  { %v71_v2 = vand.u32 2147483647, %v65_v0  ;;  %v72_v3 = vand.u32 2147483647, %v66_v1  ;;  %v67_v18 = vld [vmem:[#allocation5] sm:$0xff]  ;;  %v68_v21 = vld [vmem:[#allocation5 + $0x8] sm:$0xff] }
  0x1e   :  { %v69_v22 = vmax.f32 %v65_v0, 0.0  ;;  %v70_v25 = vmax.f32 %v66_v1, 0.0  ;;  %v99_v28 = vmul.f32 %v67_v18, %v65_v0  ;;  %v100_v30 = vmul.f32 %v68_v21, %v66_v1  ;;  %s150_s1 = sshll.u32 %s252_s0, 4  ;;  %s151_s1 = int_to_ptr.vmem [resolvable:$true] %s150_s1 }
  0x1f   :  { %v73_v4 = vsub.f32 0.0, %v71_v2  ;;  %v74_v5 = vsub.f32 0.0, %v72_v3  ;;  %v115_v40 = vmul.f32 0.9, %v67_v18  ;;  %v116_v41 = vmul.f32 0.9, %v68_v21  ;;  %p227_p11 = scmp.lt.s32.totalorder %s151_s1, %s151_s1 }
  0x20   :  { %s222_s21 = scalar_lea.vmem %s151_s1, 128 }
  0x21   :  { %v75_v6 = vmul.f32 1.442695, %v73_v4  ;;  %v77_v7 = vmul.f32 1.442695, %v74_v5  ;;  %v117_v42 = vadd.f32 0.05, %v115_v40  ;;  %p223_p10 = scmp.ne.s32.totalorder %s151_s1, %s222_s21  ;;  %p228_p12 = scmp.lt.s32.totalorder %s222_s21, %s222_s21 }
  0x22   :  { %v118_v43 = vadd.f32 0.05, %v116_v41 }
  0x23   :  { %170 = vpow2.f32 %v75_v6  ;;  %v119_v44 = vmul.f32 %v117_v42, %v65_v0  ;;  %p229_p13 = por %p228_p12, %p227_p11 }
  0x24   :  { %172 = vpow2.f32 %v77_v7  ;;  %v120_v45 = vmul.f32 %v118_v43, %v66_v1 }
  0x25   :  { %p230_p0 = pnand %p229_p13, %p223_p10 }
  0x30   :  { %v171_v8 = vpop.eup %170 }
  0x31   :  { %v173_v9 = vpop.eup %172  ;;  %v79_v10 = vadd.f32 1.0, %v171_v8  ;;  %v82_v12 = vmul.f32 -0.5, %v171_v8  ;;  %v85_v15 = vand.u32 2147483647, %v171_v8 }
  0x32   :  { %v88_v11 = vadd.f32 1.0, %v173_v9  ;;  %v91_v13 = vmul.f32 -0.5, %v173_v9  ;;  %v94_v17 = vand.u32 2147483647, %v173_v9 }
  0x33   :  { %174 = vlog2.f32 %v79_v10  ;;  %v83_v14 = vadd.f32 1.0, %v82_v12  ;;  %vm86_vm0 = vcmp.lt.f32.partialorder %v85_v15, 0.0004427343 }
  0x34   :  { %176 = vlog2.f32 %v88_v11  ;;  %v92_v16 = vadd.f32 1.0, %v91_v13  ;;  %vm95_vm1 = vcmp.lt.f32.partialorder %v94_v17, 0.0004427343 }
  0x35   :  { %v84_v19 = vmul.f32 %v171_v8, %v83_v14 }
  0x36   :  { %v93_v23 = vmul.f32 %v173_v9, %v92_v16 }
  0x40   :  { %v175_v20 = vpop.eup %174 }
  0x41   :  { %v177_v24 = vpop.eup %176  ;;  %v81_v26 = vmul.f32 0.6931472, %v175_v20 }
  0x42   :  { %v90_v27 = vmul.f32 0.6931472, %v177_v24 }
  0x43   :  { %v87_v29 = vsel %vm86_vm0, %v84_v19, %v81_v26 }
  0x44   :  { %v96_v31 = vsel %vm95_vm1, %v93_v23, %v90_v27  ;;  %v97_v32 = vadd.f32 %v87_v29, %v69_v22 }
  0x45   :  { %v98_v33 = vadd.f32 %v96_v31, %v70_v25 }
  0x46   :  { %v101_v34 = vsub.f32 %v97_v32, %v99_v28  ;;  %v121_v49 = vsub.f32 %v97_v32, %v119_v44 }
  0x47   :  { %v102_v35 = vsub.f32 %v98_v33, %v100_v30  ;;  %v122_v51 = vsub.f32 %v98_v33, %v120_v45 }
  0x48   :  { %v103_v36 = vsub.f32 0.0, %v101_v34  ;;  %v125_v55 = vmul.f32 0.2, %v121_v49 }
  0x49   :  { %v104_v37 = vsub.f32 0.0, %v102_v35  ;;  %v126_v57 = vmul.f32 0.2, %v122_v51 }
  0x4a   :  { %v105_v38 = vmul.f32 1.442695, %v103_v36 }
  0x4b   :  { %v107_v39 = vmul.f32 1.442695, %v104_v37 }
  0x4c   :  { %178 = vpow2.f32 %v105_v38 }
  0x4d   :  { %180 = vpow2.f32 %v107_v39 }
  0x59   :  { %v179_v46 = vpop.eup %178 }
  0x5a   :  { %v181_v47 = vpop.eup %180  ;;  %v109_v48 = vsub.f32 1.0, %v179_v46 }
  0x5b   :  { %v110_v50 = vsub.f32 1.0, %v181_v47 }
  0x5c   :  { %v111_v52 = vmul.f32 0.25, %v109_v48 }
  0x5d   :  { %v112_v53 = vmul.f32 0.25, %v110_v50 }
  0x5e   :  { %v113_v54 = vmul.f32 %v111_v52, %v101_v34 }
  0x5f   :  { %v114_v56 = vmul.f32 %v112_v53, %v102_v35 }
  0x60   :  { %v123_v58 = vmul.f32 0.8, %v113_v54 }
  0x61   :  { %v124_v59 = vmul.f32 0.8, %v114_v56 }
  0x62   :  { %v127_v60 = vadd.f32 %v125_v55, %v123_v58 }
  0x63   :  { %v128_v61 = vadd.f32 %v126_v57, %v124_v59 }
  0x65   :  { %v141_v62 = vadd.f32 %v128_v61, %v127_v60 }
  0x67   :  { %143 = vst [vmem:[#allocation7] sm:$0xff] %v141_v62 }
  0x68   :  { %233 = shalt.err (!%p230_p0)
}
  0x69   :  { %153 = dma.vmem_to_hbm [thread:$0]  %s151_s1, 128, %s279_s2, [#allocation4]  }
  0x6a   :  { %246 = dma.done.wait [#allocation4], 128  }
  0x6b   :  { %247 = vsyncadd [#allocation4], 4294967168 }
  0x6c   :  { %157 = vsyncpa [#allocation3], 1 }
  0x6d   :  { %158 = vsyncpa [#allocation6], 1 }
  0x6e   :  { %159 = vsyncpa [#allocation4], 1 }

</bundles_post_ra>
